<compile_context>
chip_gen: v7x
topology: tpu7x:2x2x1
jax: 0.10.0
libtpu: 0.0.40
codegen_flags: <defaults>
</compile_context>

<pallas_src>
import jax
import jax.numpy as jnp
from jax.experimental import pallas as pl
from jax.experimental.pallas import tpu as pltpu

_LANES = 128
_SUBLANES = 8


def _epe3d_kernel(x_ref, t_ref, o_ref):
    # x_ref/t_ref: (1, C, ts, 128) VMEM tiles; o_ref: (1, ts, 128).
    C = x_ref.shape[1]
    acc = None
    for c in range(C):  # static unroll; C is tiny (e.g. 3) -> stays on the VPU
        d = x_ref[0, c].astype(jnp.float32) - t_ref[0, c].astype(jnp.float32)
        acc = d * d if acc is None else acc + d * d
    # TODO(synk): no epsilon inside sqrt (matches the torch forward exactly);
    # differentiating through this would give NaN grads at zero-diff pixels.
    o_ref[0] = jnp.sqrt(acc).astype(o_ref.dtype)


def _round_up(v, m):
    return ((v + m - 1) // m) * m


def epe3d_loss(x, t, *, tile_rows=2048):
    """Pallas equivalent of torch.norm(x - t, p=2, dim=1) for NCHW inputs."""
    assert x.shape == t.shape, "input/target must have identical shapes"
    B, C, H, W = x.shape
    HW = H * W
    out_dtype = jnp.promote_types(x.dtype, t.dtype)
    x_item = jnp.dtype(x.dtype).itemsize
    t_item = jnp.dtype(t.dtype).itemsize
    o_item = jnp.dtype(out_dtype).itemsize

    # Lane-dense layout: (B, C, rows, 128). Pad ONLY for lane alignment; when
    # HW % 128 == 0 this is a free reshape (no extra HBM pass).
    rows = pl.cdiv(HW, _LANES)
    hw_pad = rows * _LANES

    # ---- Tile-size selection -------------------------------------------------
    # Cap at 2048 rows: past the HBM roofline knee on v5e/v6e/v7x while leaving
    # VMEM headroom on v7x (64 MiB physical per TensorCore).
    ts = min(int(tile_rows), 2048, rows)
    if ts < rows:
        ts = max(_SUBLANES, (ts // _SUBLANES) * _SUBLANES)

    def _working_set(ts_, nbuf):
        blk = ts_ * _LANES
        return nbuf * blk * C * (x_item + t_item) + 2 * blk * o_item

    # Safety net for unusually large C / wide dtypes: keep the pipelined
    # working set comfortably under every generation's VMEM.
    while ts > _SUBLANES and _working_set(ts, 2) > (36 << 20):
        ts = max(_SUBLANES, (ts // 2 // _SUBLANES) * _SUBLANES)

    # v7x megacore: make sure there are at least 2 grid steps to shard.
    if B * pl.cdiv(rows, ts) < 2 and rows > _SUBLANES:
        ts = _round_up(pl.cdiv(rows, 2), _SUBLANES)
    n_tiles = pl.cdiv(rows, ts)

    # Triple-buffer the inputs only when tiles are small (DMA latency then
    # dominates the per-step time); otherwise default double buffering.
    use_triple = ts < 512 and B * n_tiles >= 4
    working = _working_set(ts, 3 if use_triple else 2)
    vmem_limit = int(min(max(2 * working, 16 << 20), 56 << 20))

    def _prep(a):
        a = a.reshape(B, C, HW)
        if hw_pad != HW:
            a = jnp.pad(a, ((0, 0), (0, 0), (0, hw_pad - HW)))
        return a.reshape(B, C, rows, _LANES)

    xf = _prep(x)
    tf = _prep(t)

    cost = pl.CostEstimate(
        flops=3 * C * B * hw_pad,            # sub + mul + add per channel
        transcendentals=B * hw_pad,          # sqrt per output pixel
        bytes_accessed=B * hw_pad * (C * (x_item + t_item) + o_item),
    )

    in_kwargs = {"pipeline_mode": pl.Buffered(3)} if use_triple else {}

    def _in_spec():
        return pl.BlockSpec((1, C, ts, _LANES), lambda b, s: (b, 0, s, 0),
                            **in_kwargs)

    out_pad = pl.pallas_call(
        _epe3d_kernel,
        out_shape=jax.ShapeDtypeStruct((B, rows, _LANES), out_dtype),
        grid_spec=pltpu.PrefetchScalarGridSpec(
            num_scalar_prefetch=0,
            grid=(B, n_tiles),
            in_specs=[_in_spec(), _in_spec()],
            out_specs=pl.BlockSpec((1, ts, _LANES), lambda b, s: (b, s, 0)),
        ),
        compiler_params=pltpu.CompilerParams(
            dimension_semantics=("parallel", "parallel"),
            vmem_limit_bytes=vmem_limit,
        ),
        cost_estimate=cost,
    )(xf, tf)

    # Drop lane-alignment padding (no-op when HW % 128 == 0) and restore (B,H,W).
    out = out_pad.reshape(B, hw_pad)
    if hw_pad != HW:
        out = out[:, :HW]
    return out.reshape(B, H, W)


if __name__ == "__main__":
    key = jax.random.PRNGKey(0)
    k1, k2 = jax.random.split(key)

    def _ref(a, b):
        d = a.astype(jnp.float32) - b.astype(jnp.float32)
        return jnp.sqrt(jnp.sum(d * d, axis=1))

    # 1) Typical small EPE3D shape; HW % 128 == 0 -> zero-copy (no-pad) path.
    B, C, H, W = 2, 3, 16, 16
    x = jax.random.normal(k1, (B, C, H, W), dtype=jnp.float32)
    t = jax.random.normal(k2, (B, C, H, W), dtype=jnp.float32)
    out = jax.block_until_ready(epe3d_loss(x, t))
    assert out.shape == (B, H, W)
    assert jnp.allclose(out, _ref(x, t), atol=1e-5, rtol=1e-5)

    # 2) Non-multiple-of-128 spatial size -> lane-alignment padding path.
    xo = jax.random.normal(k1, (2, 3, 13, 9), dtype=jnp.float32)
    to = jax.random.normal(k2, (2, 3, 13, 9), dtype=jnp.float32)
    outo = jax.block_until_ready(epe3d_loss(xo, to))
    assert outo.shape == (2, 13, 9)
    assert jnp.allclose(outo, _ref(xo, to), atol=1e-5, rtol=1e-5)

    # 3) B == 1: exercises the megacore tile split + partial trailing block.
    xs = jax.random.normal(k1, (1, 3, 33, 64), dtype=jnp.float32)
    ts_ = jax.random.normal(k2, (1, 3, 33, 64), dtype=jnp.float32)
    outs = jax.block_until_ready(epe3d_loss(xs, ts_))
    assert outs.shape == (1, 33, 64)
    assert jnp.allclose(outs, _ref(xs, ts_), atol=1e-5, rtol=1e-5)

    # 4) Forced small tiles -> multi-tile grid with triple-buffered inputs.
    xm = jax.random.normal(k1, (2, 3, 32, 128), dtype=jnp.float32)
    tm = jax.random.normal(k2, (2, 3, 32, 128), dtype=jnp.float32)
    outm = jax.block_until_ready(epe3d_loss(xm, tm, tile_rows=8))
    assert outm.shape == (2, 32, 128)
    assert jnp.allclose(outm, _ref(xm, tm), atol=1e-5, rtol=1e-5)

    print("KERNEL_OK")
</pallas_src>

<mosaic_0001>
module attributes {stable_mosaic.version = 11 : i64} {
  func.func @_epe3d_kernel(%arg0: i32, %arg1: i32, %arg2: memref<1x3x2x128xf32, #tpu.memory_space<vmem>>, %arg3: memref<1x3x2x128xf32, #tpu.memory_space<vmem>>, %arg4: memref<1x2x128xf32, #tpu.memory_space<vmem>>) attributes {dimension_semantics = [#tpu.dimension_semantics<parallel>, #tpu.dimension_semantics<parallel>], iteration_bounds = array<i64: 2, 1>, scalar_prefetch = 0 : i64, scratch_operands = 0 : i64, tpu.core_type = #tpu.core_type<tc>, window_params = [{transform_indices = @transform_0, window_bounds = array<i64: 1, 3, 2, 128>}, {transform_indices = @transform_1, window_bounds = array<i64: 1, 3, 2, 128>}, {transform_indices = @transform_2, window_bounds = array<i64: 1, 2, 128>}]} {
    %c0 = arith.constant 0 : index
    %c0_0 = arith.constant 0 : index
    %c0_1 = arith.constant 0 : index
    %c0_2 = arith.constant 0 : index
    %0 = vector.load %arg2[%c0, %c0_0, %c0_1, %c0_2] : memref<1x3x2x128xf32, #tpu.memory_space<vmem>>, vector<1x1x2x128xf32>
    %1 = vector.shape_cast %0 : vector<1x1x2x128xf32> to vector<2x128xf32>
    %c0_3 = arith.constant 0 : index
    %c0_4 = arith.constant 0 : index
    %c0_5 = arith.constant 0 : index
    %c0_6 = arith.constant 0 : index
    %2 = vector.load %arg3[%c0_3, %c0_4, %c0_5, %c0_6] : memref<1x3x2x128xf32, #tpu.memory_space<vmem>>, vector<1x1x2x128xf32>
    %3 = vector.shape_cast %2 : vector<1x1x2x128xf32> to vector<2x128xf32>
    %4 = arith.subf %1, %3 : vector<2x128xf32>
    %5 = arith.mulf %4, %4 : vector<2x128xf32>
    %c0_7 = arith.constant 0 : index
    %c1 = arith.constant 1 : index
    %c0_8 = arith.constant 0 : index
    %c0_9 = arith.constant 0 : index
    %6 = vector.load %arg2[%c0_7, %c1, %c0_8, %c0_9] : memref<1x3x2x128xf32, #tpu.memory_space<vmem>>, vector<1x1x2x128xf32>
    %7 = vector.shape_cast %6 : vector<1x1x2x128xf32> to vector<2x128xf32>
    %c0_10 = arith.constant 0 : index
    %c1_11 = arith.constant 1 : index
    %c0_12 = arith.constant 0 : index
    %c0_13 = arith.constant 0 : index
    %8 = vector.load %arg3[%c0_10, %c1_11, %c0_12, %c0_13] : memref<1x3x2x128xf32, #tpu.memory_space<vmem>>, vector<1x1x2x128xf32>
    %9 = vector.shape_cast %8 : vector<1x1x2x128xf32> to vector<2x128xf32>
    %10 = arith.subf %7, %9 : vector<2x128xf32>
    %11 = arith.mulf %10, %10 : vector<2x128xf32>
    %12 = arith.addf %5, %11 : vector<2x128xf32>
    %c0_14 = arith.constant 0 : index
    %c2 = arith.constant 2 : index
    %c0_15 = arith.constant 0 : index
    %c0_16 = arith.constant 0 : index
    %13 = vector.load %arg2[%c0_14, %c2, %c0_15, %c0_16] : memref<1x3x2x128xf32, #tpu.memory_space<vmem>>, vector<1x1x2x128xf32>
    %14 = vector.shape_cast %13 : vector<1x1x2x128xf32> to vector<2x128xf32>
    %c0_17 = arith.constant 0 : index
    %c2_18 = arith.constant 2 : index
    %c0_19 = arith.constant 0 : index
    %c0_20 = arith.constant 0 : index
    %15 = vector.load %arg3[%c0_17, %c2_18, %c0_19, %c0_20] : memref<1x3x2x128xf32, #tpu.memory_space<vmem>>, vector<1x1x2x128xf32>
    %16 = vector.shape_cast %15 : vector<1x1x2x128xf32> to vector<2x128xf32>
    %17 = arith.subf %14, %16 : vector<2x128xf32>
    %18 = arith.mulf %17, %17 : vector<2x128xf32>
    %19 = arith.addf %12, %18 : vector<2x128xf32>
    %20 = math.sqrt %19 : vector<2x128xf32>
    %c0_21 = arith.constant 0 : index
    %c0_22 = arith.constant 0 : index
    %c0_23 = arith.constant 0 : index
    %21 = vector.load %arg4[%c0_21, %c0_22, %c0_23] : memref<1x2x128xf32, #tpu.memory_space<vmem>>, vector<1x2x128xf32>
    %22 = vector.shape_cast %21 : vector<1x2x128xf32> to vector<2x128xf32>
    %23 = vector.shape_cast %20 : vector<2x128xf32> to vector<1x2x128xf32>
    tpu.vector_store %arg4[%c0_21, %c0_22, %c0_23], %23 {strides = array<i32>} : memref<1x2x128xf32, #tpu.memory_space<vmem>>, vector<1x2x128xf32>,
    return
  }
  func.func @transform_0(%arg0: i32, %arg1: i32) -> (i32, i32, i32, i32) {
    %c0_i32 = arith.constant 0 : i32
    %c0_i32_0 = arith.constant 0 : i32
    %c0_i32_1 = arith.constant 0 : i32
    return %arg0, %c0_i32, %arg1, %c0_i32_0 : i32, i32, i32, i32
  }
  func.func @transform_1(%arg0: i32, %arg1: i32) -> (i32, i32, i32, i32) {
    %c0_i32 = arith.constant 0 : i32
    %c0_i32_0 = arith.constant 0 : i32
    %c0_i32_1 = arith.constant 0 : i32
    return %arg0, %c0_i32, %arg1, %c0_i32_0 : i32, i32, i32, i32
  }
  func.func @transform_2(%arg0: i32, %arg1: i32) -> (i32, i32, i32) {
    %c0_i32 = arith.constant 0 : i32
    %c0_i32_0 = arith.constant 0 : i32
    return %arg0, %arg1, %c0_i32 : i32, i32, i32
  }
}

</mosaic_0001>

<bundles_post_ra>
// kernel: tpu_custom_call.1
= control target key start
LH: loop header
LB: loop body
LE: loop exit
PB: predicated region body
PF: predicated region fallthrough
CT: control target
= control target key end

     0   :  { %7 = vsyncpa [#allocation3], 0  ;;  %s864_s0 = inlined_call_operand.hbm [shape: f32[2,3,2,128], index: 0, kind: input, shape index: {}]   ;;  %s865_s1 = inlined_call_operand.hbm [shape: f32[2,3,2,128], index: 1, kind: input, shape index: {}]   ;;  %s866_s2 = inlined_call_operand.hbm [shape: f32[2,2,128], index: 2, kind: output, shape index: {}]  }
   0x1   :  { %9 = vsyncpa [#allocation3 + $0x1], 0 }
   0x2   :  { %10 = vsyncpa [#allocation6], 0 }
   0x3   :  { %12 = vsyncpa [#allocation6 + $0x1], 0 }
   0x4   :  { %13 = vsyncpa [#allocation4], 0 }
   0x5   :  { %15 = vsyncpa [#allocation4 + $0x1], 0  ;;  %s629_s9 = smov 0   ;;  %s631_s10 = smov 0  }
   0x6   :  { %s633_s11 = smov 0   ;;  %s635_s12 = smov 0  }
   0x7   :  { %s637_s13 = smov 0   ;;  %s639_s14 = smov 0  }
   0x8 LB: > { %s369_s15 = sadd.s32 4294967295, %s607_s14   ;;  %s370_s16 = sadd.s32 4294967294, %s607_s14   ;;  %s607_s14 = sphi %s639_s14, %s21_s14   ;;  %s603_s13 = sphi %s637_s13, %s884_s13   ;;  %s599_s12 = sphi %s635_s12, %s883_s12   ;;  %s595_s11 = sphi %s633_s11, %s882_s11   ;;  %s591_s10 = sphi %s631_s10, %s881_s10   ;;  %s587_s9 = sphi %s629_s9, %s880_s9  }
   0x9   : > { %s33_s17 = sadd.s32 1, %s603_s13  ;;  %s42_s18 = sadd.s32 1, %s595_s11 }
   0xa   : > { %p35_p0 = scmp.ge.s32.totalorder %s33_s17, 2  ;;  %p49_p1 = scmp.ne.s32.totalorder %s595_s11, %s591_s10 }
   0xb   : > { %p50_p2 = scmp.eq.s32.totalorder %s607_s14, 0  ;;  %p55_p3 = scmp.ne.s32.totalorder %s591_s10, %s587_s9 }
   0xc   : > { %s886_s17 = smov (%p35_p0, %s33_s17), 0  ;;  %p56_p5 = scmp.eq.s32.totalorder %s369_s15, 0 }
   0xd   : > { %p670_p4 = por %p50_p2, %p49_p1  ;;  %s37_s20 = ssub.s32 %s603_s13, %s886_s17 }
   0xe   : > { %p109_p6 = scmp.eq.s32.totalorder %s369_s15, 1  ;;  %p40_p7 = scmp.eq.s32.totalorder %s37_s20, 0 }
   0xf   : > { %p676_p8 = por %p56_p5, %p55_p3  ;;  %p115_p10 = scmp.eq.s32.totalorder %s370_s16, 1 }
  0x10   : > { %p680_p9 = por %p109_p6, %p49_p1  ;;  %p407_p13 = scmp.lt.s32.totalorder %s607_s14, 2 }
  0x11   : > { %s870_s21 = scalar_select %p676_p8, 1, 0 }
  0x12   : > { %s871_s22 = scalar_select %p680_p9, 1, 0 }
  0x13   : > { %s685_s23 = scalar_select %p40_p7, %s595_s11, %s42_s18  }
  0x14   : > { %p687_p11 = por %p115_p10, %p55_p3  ;;  %s694_s25 = sand.u32 1, %s595_s11  }
  0x15   : > { %s385_s26 = smul.u32 6, %s694_s25  ;;  %p700_p0 = pnand %p407_p13, %p670_p4 }
  0x16   : > { %s872_s24 = scalar_select %p687_p11, 1, 0 }
  0x17   : > { %s386_s27 = smul.u32 96, %s603_s13  ;;  %s139_s4 = scalar_lea.vmem [#allocation2], %s385_s26 }
  0x18   : > { %s147_s5 = sshll.u32 %s139_s4, 4  ;;  %s136_s6 = scalar_lea.sflag [#allocation3], %s694_s25  ;;  %s713_s5 = int_to_ptr.vmem [resolvable:$true] %s147_s5 }
  0x19   : > { %s709_s3 = scalar_lea.hbm %s864_s0, %s386_s27  ;;  %p463_p3 = pneg %p700_p0 }
  0x1a   : > { %s461_s7 = scalar_lea.hbm %s709_s3, 96  ;;  %s466_s16 = scalar_lea.hbm %s864_s0, 192 }
  0x1b   : > { %p462_p2 = scmp.ne.s32.totalorder %s709_s3, %s461_s7  ;;  %p467_p6 = scmp.lt.u32.totalorder %s709_s3, %s864_s0 }
  0x1c   : > { %p468_p7 = scmp.lt.u32.totalorder %s466_s16, %s461_s7  ;;  %p470_p13 = scmp.lt.u32.totalorder %s461_s7, %s709_s3 }
  0x1d   : > { %p464_p4 = pnand %p463_p3, %p462_p2 }
  0x1e   : > { %p469_p10 = por %p468_p7, %p467_p6 }
  0x1f   : > { %p465_p5 = pneg %p464_p4 }
  0x20   : > { %p471_p12 = por %p470_p13, %p469_p10 }
  0x22   : > { %p472_p1 = pnand %p471_p12, %p465_p5 }
  0x24   : > { %475 = shalt.err (!%p472_p1)
}
  0x25   : > { %s476_s20 = scalar_lea.vmem %s713_s5, 96  ;;  %s609_s29 = smov [#allocation2]  }
  0x26   : > { %p477_p2 = scmp.ne.s32.totalorder %s713_s5, %s476_s20  ;;  %s481_s30 = sshll.u32 %s609_s29, 4  ;;  %s482_s30 = int_to_ptr.vmem [resolvable:$false] %s481_s30 }
  0x27   : > { %s483_s4 = scalar_lea.vmem %s482_s30, 192  ;;  %p484_p9 = scmp.lt.s32.totalorder %s713_s5, %s482_s30 }
  0x28   : > { %p479_p4 = pnand %p477_p2, %p463_p3  ;;  %p485_p6 = scmp.lt.s32.totalorder %s483_s4, %s476_s20 }
  0x2a   : > { %p480_p11 = pneg %p479_p4  ;;  %p486_p7 = por %p485_p6, %p484_p9 }
  0x2c   : > { %p487_p10 = pnand %p486_p7, %p480_p11 }
  0x2e   : > { %490 = shalt.err (!%p487_p10)
}
  0x2f   : > { %s610_s7 = smov 32   ;;  %s611_s8 = smov 2  }
  0x30   : > { %399 = dma.hbm_to_vmem [thread:$0]  (!%p700_p0), %s709_s3, 96, %s713_s5, %s136_s6, %s610_s7, %s610_s7, %s611_s8  }
  0x31   : > { %p177_p9 = scmp.lt.s32.totalorder %s607_s14, 3  ;;  %s753_s18 = scalar_lea.hbm %s865_s1, %s386_s27 }
  0x32   : > { %p874_p11 = scmp.ge.s32.totalorder %s607_s14, 1  ;;  %s161_s20 = scalar_lea.vmem [#allocation5], %s385_s26 }
  0x33   : > { %s169_s29 = sshll.u32 %s161_s20, 4  ;;  %s158_s3 = scalar_lea.sflag [#allocation6], %s694_s25  ;;  %s763_s29 = int_to_ptr.vmem [resolvable:$true] %s169_s29 }
  0x34   : > { %p757_p12 = pnand %p874_p11, %p177_p9  ;;  %s491_s5 = scalar_lea.hbm %s753_s18, 96 }
  0x35   : > { %p492_p1 = scmp.ne.s32.totalorder %s753_s18, %s491_s5  ;;  %s496_s30 = scalar_lea.hbm %s865_s1, 192 }
  0x36   : > { %p497_p2 = scmp.lt.u32.totalorder %s753_s18, %s865_s1  ;;  %p498_p4 = scmp.lt.u32.totalorder %s496_s30, %s491_s5 }
  0x37   : > { %p494_p5 = pnand %p492_p1, %p463_p3  ;;  %p500_p7 = scmp.lt.u32.totalorder %s491_s5, %s753_s18 }
  0x38   : > { %p499_p6 = por %p498_p4, %p497_p2 }
  0x39   : > { %p495_p13 = pneg %p494_p5 }
  0x3a   : > { %p501_p10 = por %p500_p7, %p499_p6 }
  0x3c   : > { %p502_p9 = pnand %p501_p10, %p495_p13 }
  0x3e   : > { %505 = shalt.err (!%p502_p9)
}
  0x3f   : > { %s506_s26 = scalar_lea.vmem %s763_s29, 96  ;;  %s612_s16 = smov [#allocation5]  }
  0x40   : > { %p507_p11 = scmp.ne.s32.totalorder %s763_s29, %s506_s26  ;;  %s511_s20 = sshll.u32 %s612_s16, 4  ;;  %s512_s20 = int_to_ptr.vmem [resolvable:$false] %s511_s20 }
  0x41   : > { %s513_s27 = scalar_lea.vmem %s512_s20, 192  ;;  %p514_p8 = scmp.lt.s32.totalorder %s763_s29, %s512_s20 }
  0x42   : > { %p509_p1 = pnand %p507_p11, %p463_p3  ;;  %p515_p2 = scmp.lt.s32.totalorder %s513_s27, %s506_s26 }
  0x44   : > { %p510_p5 = pneg %p509_p1  ;;  %p516_p4 = por %p515_p2, %p514_p8 }
  0x46   : > { %p517_p6 = pnand %p516_p4, %p510_p5 }
  0x48   : > { %520 = shalt.err (!%p517_p6)
}
  0x49   : > { %402 = dma.hbm_to_vmem [thread:$0]  (!%p700_p0), %s753_s18, 96, %s763_s29, %s158_s3, %s610_s7, %s610_s7, %s611_s8  }
  0x4a   : > { %181 = sbr.rel (%p757_p12) target bundleno = 123 (0x7b), region = 28  ;;  %s797_s5 = sand.u32 (!%p757_p12), 1, %s591_s10  }
  0x4b   : > { %s389_s6 = smul.u32 (!%p757_p12), 6, %s797_s5  ;;  %s184_s30 = scalar_lea.sflag (!%p757_p12), [#allocation3], %s797_s5 }
  0x4c   : > { %p876_p8 = scmp.ne.s32.totalorder (!%p757_p12), %s870_s21, 0 }
  0x4d   : > { %s187_s28 = scalar_lea.vmem (!%p757_p12), [#allocation2], %s389_s6 }
  0x51   : > { %574 = dma.done.wait (%p876_p8), %s184_s30, 96  }
  0x52   : > { %576 = vsyncadd (%p876_p8), %s184_s30, 4294967200  ;;  %s193_s25 = scalar_lea.sflag [#allocation6], %s797_s5  ;;  %s196_s7 = scalar_lea.vmem [#allocation5], %s389_s6 }
  0x53   : > { %578 = dma.done.wait (%p876_p8), %s193_s25, 96  }
  0x54   : > { %580 = vsyncadd (%p876_p8), %s193_s25, 4294967200  ;;  %v222_v0 = vld [vmem:[%s187_s28] sm:$0x3]  ;;  %v223_v1 = vld [vmem:[%s196_s7] sm:$0x3]  ;;  %s376_s21 = sshll.u32 %s797_s5, 1 }
  0x55   : > { %v377_v2 = vld [vmem:[%s187_s28 + $0x2] sm:$0x3]  ;;  %v224_v3 = vsub.f32 %v222_v0, %v223_v1  ;;  %v378_v4 = vld [vmem:[%s196_s7 + $0x2] sm:$0x3]  ;;  %v379_v5 = vld [vmem:[%s187_s28 + $0x4] sm:$0x3] }
  0x56   : > { %v380_v6 = vld [vmem:[%s196_s7 + $0x4] sm:$0x3]  ;;  %v230_v7 = vsub.f32 %v377_v2, %v378_v4  ;;  %s221_s8 = scalar_lea.vmem [#allocation7], %s376_s21  ;;  %s382_s19 = sshll.u32 %s599_s12, 5 }
  0x57   : > { %v237_v8 = vsub.f32 %v379_v5, %v380_v6  ;;  %v225_v9 = vmul.f32 %v224_v3, %v224_v3  ;;  %s263_s18 = sshll.u32 %s221_s8, 4  ;;  %s817_s4 = scalar_lea.hbm %s866_s2, %s382_s19  ;;  %s812_s18 = int_to_ptr.vmem [resolvable:$true] %s263_s18 }
  0x58   : > { %v231_v10 = vmul.f32 %v230_v7, %v230_v7  ;;  %s249_s15 = scalar_lea.sflag [#allocation4], %s797_s5  ;;  %s521_s26 = scalar_lea.vmem %s812_s18, 32 }
  0x59   : > { %v238_v11 = vmul.f32 %v237_v8, %v237_v8  ;;  %p522_p0 = scmp.ne.s32.totalorder %s812_s18, %s521_s26  ;;  %p877_p3 = scmp.ne.s32.totalorder %s871_s22, 0 }
  0x5a   : > { %v232_v12 = vadd.f32 %v231_v10, %v225_v9  ;;  %s613_s12 = smov [#allocation7]  }
  0x5b   : > { %p523_p12 = pnand %p522_p0, %p877_p3  ;;  %s525_s16 = sshll.u32 %s613_s12, 4  ;;  %s526_s16 = int_to_ptr.vmem [resolvable:$false] %s525_s16 }
  0x5c   : > { %v239_v13 = vadd.f32 %v238_v11, %v232_v12  ;;  %s527_s20 = scalar_lea.vmem %s526_s16, 64  ;;  %p528_p7 = scmp.lt.s32.totalorder %s812_s18, %s526_s16 }
  0x5d   : > { %p524_p13 = pneg %p523_p12  ;;  %p529_p10 = scmp.lt.s32.totalorder %s527_s20, %s521_s26 }
  0x5e   : > { %459 = vrsqrt.f32 %v239_v13  ;;  %vm242_vm0 = vcmp.eq.f32.partialorder %v239_v13, inf  ;;  %v245_v15 = vand.u32 2147483648, %v239_v13  ;;  %vm244_vm1 = vcmp.eq.f32.partialorder %v239_v13, 0.0 }
  0x5f   : > { %p530_p9 = por %p529_p10, %p528_p7 }
  0x61   : > { %p531_p11 = pnand %p530_p9, %p524_p13 }
  0x68   : > { %v460_v14 = vpop.eup %459 }
  0x69   : > { %v241_v16 = vmul.f32 %v460_v14, %v239_v13 }
  0x6b   : > { %v243_v17 = vsel %vm242_vm0, %v239_v13, %v241_v16 }
  0x6c   : > { %v246_v18 = vsel %vm244_vm1, %v245_v15, %v243_v17 }
  0x6d   : > { %247 = vst [vmem:[%s221_s8] sm:$0x3] %v246_v18 }
  0x6e   : > { %534 = shalt.err (!%p531_p11)
}
  0x6f   : > { %s535_s27 = scalar_lea.hbm %s817_s4, 32  ;;  %s539_s30 = scalar_lea.hbm %s866_s2, 64 }
  0x70   : > { %p536_p1 = scmp.ne.s32.totalorder %s817_s4, %s535_s27  ;;  %p540_p4 = scmp.lt.u32.totalorder %s817_s4, %s866_s2 }
  0x71   : > { %p541_p6 = scmp.lt.u32.totalorder %s539_s30, %s535_s27  ;;  %p543_p0 = scmp.lt.u32.totalorder %s535_s27, %s817_s4 }
  0x72   : > { %p537_p5 = pnand %p536_p1, %p877_p3 }
  0x73   : > { %p542_p8 = por %p541_p6, %p540_p4 }
  0x74   : > { %p538_p2 = pneg %p537_p5 }
  0x75   : > { %p544_p12 = por %p543_p0, %p542_p8 }
  0x77   : > { %p545_p13 = pnand %p544_p12, %p538_p2 }
  0x79   : > { %548 = shalt.err (!%p545_p13)
}
  0x7a   : > { %394 = dma.vmem_to_hbm [thread:$0]  (%p877_p3), %s812_s18, 32, %s817_s4, %s249_s15  }
  0x7b PF: > { %s275_s7 = sand.u32 1, %s587_s9   ;;  %p878_p7 = scmp.ne.s32.totalorder %s872_s24, 0 }
  0x7c   : > { %p879_p10 = scmp.ge.s32.totalorder %s607_s14, 2  ;;  %s276_s21 = scalar_lea.sflag [#allocation4], %s275_s7 }
  0x7e   : > { %p404_p9 = pnand %p879_p10, %p878_p7 }
  0x80   : > { %582 = dma.done.wait (!%p404_p9), %s276_s21, 32  }
  0x81   : > { %584 = vsyncadd (!%p404_p9), %s276_s21, 4294967264  ;;  %s21_s14 = sadd.s32 1, %s607_s14   ;;  %s880_s9 = smov %s591_s10 }
  0x82   : > { %p18_p11 = scmp.ge.s32.totalorder %s21_s14, 4   ;;  %s881_s10 = smov %s595_s11 }
  0x83   : > { %s882_s11 = smov %s685_s23  ;;  %s883_s12 = smov %s603_s13 }
  0x84   : > { %s884_s13 = smov %s886_s17  ;;  %20 = sbr.rel (!%p18_p11) target bundleno = 8 (0x8), region = 90 }
  0x8b   :  { %281 = vsyncpa [#allocation3], 1 }
  0x8c   :  { %283 = vsyncpa [#allocation3 + $0x1], 1 }
  0x8d   :  { %284 = vsyncpa [#allocation6], 1 }
  0x8e   :  { %286 = vsyncpa [#allocation6 + $0x1], 1 }
  0x8f   :  { %287 = vsyncpa [#allocation4], 1 }
  0x90   :  { %289 = vsyncpa [#allocation4 + $0x1], 1 }

</bundles_post_ra>
